<compile_context>
chip_gen: v5e
topology: v5e:2x2
jax: 0.10.0
libtpu: 0.0.40
codegen_flags: <defaults>
</compile_context>

<pallas_src>
import jax
import jax.numpy as jnp
from jax.experimental import pallas as pl
from jax.experimental.pallas import tpu as pltpu

SUBLANES = 8


def _round_up(x, m):
    return ((x + m - 1) // m) * m


def encoder_kernel(x_ref,
                   w1_ref, b1_ref,
                   w2_ref, b2_ref,
                   wh_ref, bh_ref,
                   mu_ref, ls_ref):
    d_out = mu_ref.shape[-1]
    x = x_ref[...]

    # linear1 + ReLU (f32 accumulation / elementwise regardless of operand dtype)
    h1 = jnp.dot(x, w1_ref[...], preferred_element_type=jnp.float32) + b1_ref[...]
    h1 = jnp.maximum(h1, 0.0).astype(w2_ref.dtype)

    # linear2 + ReLU
    h2 = jnp.dot(h1, w2_ref[...], preferred_element_type=jnp.float32) + b2_ref[...]
    h2 = jnp.maximum(h2, 0.0).astype(wh_ref.dtype)

    # fused (mu | log_sigma) head -> one MXU matmul, split in VMEM, two stores.
    head = jnp.dot(h2, wh_ref[...], preferred_element_type=jnp.float32) + bh_ref[...]
    mu_ref[...] = head[:, :d_out]
    ls_ref[...] = head[:, d_out:]


def init_params(key, D_in, H, D_out):
    """Deterministic init mimicking torch.nn.Linear's U(-1/sqrt(in), 1/sqrt(in)).
    Weights are stored as (in, out) = PyTorch weight transposed."""
    ks = jax.random.split(key, 8)

    def linear(kw, kb, fan_in, fan_out):
        bound = 1.0 / jnp.sqrt(jnp.float32(fan_in))
        w = jax.random.uniform(kw, (fan_in, fan_out), jnp.float32, -bound, bound)
        b = jax.random.uniform(kb, (1, fan_out), jnp.float32, -bound, bound)
        return w, b

    w1, b1 = linear(ks[0], ks[1], D_in, H)
    w2, b2 = linear(ks[2], ks[3], H, 32)
    w_mu, b_mu = linear(ks[4], ks[5], 32, D_out)
    w_ls, b_ls = linear(ks[6], ks[7], 32, D_out)

    return dict(w1=w1, b1=b1, w2=w2, b2=b2,
                w_mu=w_mu, b_mu=b_mu, w_ls=w_ls, b_ls=b_ls)


def pack_params(params, dtype=jnp.float32):
    """Fuse the mu/log_sigma heads into one (32, 2*D_out) weight (no zero padding).
    Optionally cast weights (not biases) to bf16 for v6e/v7x MXU / HBM savings.
    Done ONCE (not per call)."""
    w_head = jnp.concatenate([params["w_mu"], params["w_ls"]], axis=1)
    b_head = jnp.concatenate([params["b_mu"], params["b_ls"]], axis=1)
    d_out = params["w_mu"].shape[1]

    packed = dict(
        w1=params["w1"].astype(dtype), b1=params["b1"],     # biases stay f32
        w2=params["w2"].astype(dtype), b2=params["b2"],
        w_head=w_head.astype(dtype), b_head=b_head)
    return packed, d_out


def encoder_forward(x, packed, d_out, block_b=2048):
    """x: (B, D_in). packed: output of pack_params. Returns (mu, log_sigma) in f32."""
    B, D_in = x.shape
    H1 = packed["w1"].shape[1]
    H2 = packed["w2"].shape[1]
    n_head = packed["w_head"].shape[1]       # 2 * d_out
    w_dtype = packed["w1"].dtype
    if x.dtype != w_dtype:                   # cast once in the wrapper (bf16 mode)
        x = x.astype(w_dtype)

    # Batch tile: ~half of B (rounded to the sublane multiple) so that whenever
    # there is more than one tile's worth of rows the "parallel" axis has >=2
    # steps (v7x megacore), capped at block_b.  No wrapper-side padding; the
    # partial last tile is masked by Pallas.
    bt = min(block_b, max(SUBLANES, _round_up(pl.cdiv(B, 2), SUBLANES)))
    grid = (pl.cdiv(B, bt),)
    full = lambda i: (0, 0)                  # weights/biases resident across all tiles

    flops = 2 * B * (D_in * H1 + H1 * H2 + H2 * n_head)
    weight_bytes = sum(int(v.size) * v.dtype.itemsize for v in packed.values())
    bytes_accessed = int(B * D_in * x.dtype.itemsize        # x read
                         + B * n_head * 4                   # mu + log_sigma write
                         + weight_bytes)

    mu, log_sigma = pl.pallas_call(
        encoder_kernel,
        out_shape=(jax.ShapeDtypeStruct((B, d_out), jnp.float32),
                   jax.ShapeDtypeStruct((B, d_out), jnp.float32)),
        grid_spec=pltpu.PrefetchScalarGridSpec(
            num_scalar_prefetch=0,
            grid=grid,
            in_specs=[
                pl.BlockSpec((bt, D_in), lambda i: (i, 0)),
                pl.BlockSpec(packed["w1"].shape, full),
                pl.BlockSpec(packed["b1"].shape, full),
                pl.BlockSpec(packed["w2"].shape, full),
                pl.BlockSpec(packed["b2"].shape, full),
                pl.BlockSpec(packed["w_head"].shape, full),
                pl.BlockSpec(packed["b_head"].shape, full),
            ],
            out_specs=[pl.BlockSpec((bt, d_out), lambda i: (i, 0)),
                       pl.BlockSpec((bt, d_out), lambda i: (i, 0))],
        ),
        compiler_params=pltpu.CompilerParams(
            dimension_semantics=("parallel",),   # v7x: shard batch tiles over 2 TCs
        ),
        cost_estimate=pl.CostEstimate(flops=flops, transcendentals=0,
                                      bytes_accessed=bytes_accessed),
    )(x, packed["w1"], packed["b1"], packed["w2"], packed["b2"],
      packed["w_head"], packed["b_head"])

    return mu, log_sigma


def encoder_ref(x, p):
    """Pure-JAX reference for correctness checking."""
    h1 = jnp.maximum(x @ p["w1"] + p["b1"], 0.0)
    h2 = jnp.maximum(h1 @ p["w2"] + p["b2"], 0.0)
    return h2 @ p["w_mu"] + p["b_mu"], h2 @ p["w_ls"] + p["b_ls"]


if __name__ == "__main__":
    # Shapes consistent with the module: Encoder(D_in=64, H=32, D_out=8)
    B, D_in, H, D_out = 8, 64, 32, 8

    key = jax.random.PRNGKey(0)
    k_x, k_p, k_xb = jax.random.split(key, 3)

    x = jax.random.normal(k_x, (B, D_in), jnp.float32)
    params = init_params(k_p, D_in, H, D_out)
    packed, d_out = pack_params(params)            # f32 operands (default)

    # Small-batch (single tile, grid of 1) path.
    mu, log_sigma = encoder_forward(x, packed, d_out)
    jax.block_until_ready((mu, log_sigma))

    mu_ref, ls_ref = encoder_ref(x, params)
    assert mu.shape == (B, D_out) and log_sigma.shape == (B, D_out)
    assert jnp.allclose(mu, mu_ref, atol=1e-5, rtol=1e-5)
    assert jnp.allclose(log_sigma, ls_ref, atol=1e-5, rtol=1e-5)

    # Batched path: multi-step grid + masked partial last tile (no wrapper pad).
    Bb = 300
    xb = jax.random.normal(k_xb, (Bb, D_in), jnp.float32)
    mu_b, ls_b = encoder_forward(xb, packed, d_out, block_b=128)
    jax.block_until_ready((mu_b, ls_b))

    mu_b_ref, ls_b_ref = encoder_ref(xb, params)
    assert mu_b.shape == (Bb, D_out) and ls_b.shape == (Bb, D_out)
    assert jnp.allclose(mu_b, mu_b_ref, atol=1e-5, rtol=1e-5)
    assert jnp.allclose(ls_b, ls_b_ref, atol=1e-5, rtol=1e-5)

    # bf16-operand path (f32 accumulation): halves the x-side HBM stream on v6e/v7x.
    packed_bf16, _ = pack_params(params, dtype=jnp.bfloat16)
    mu_h, ls_h = encoder_forward(xb, packed_bf16, d_out, block_b=128)
    jax.block_until_ready((mu_h, ls_h))
    assert mu_h.dtype == jnp.float32 and ls_h.dtype == jnp.float32
    assert jnp.allclose(mu_h, mu_b_ref, atol=1e-1, rtol=1e-1)
    assert jnp.allclose(ls_h, ls_b_ref, atol=1e-1, rtol=1e-1)

    print("KERNEL_OK")
</pallas_src>

<mosaic_0001>
module attributes {stable_mosaic.version = 11 : i64} {
  func.func @encoder_kernel(%arg0: i32, %arg1: memref<8x64xf32, #tpu.memory_space<vmem>>, %arg2: memref<64x32xf32, #tpu.memory_space<vmem>>, %arg3: memref<1x32xf32, #tpu.memory_space<vmem>>, %arg4: memref<32x32xf32, #tpu.memory_space<vmem>>, %arg5: memref<1x32xf32, #tpu.memory_space<vmem>>, %arg6: memref<32x16xf32, #tpu.memory_space<vmem>>, %arg7: memref<1x16xf32, #tpu.memory_space<vmem>>, %arg8: memref<8x8xf32, #tpu.memory_space<vmem>>, %arg9: memref<8x8xf32, #tpu.memory_space<vmem>>) attributes {dimension_semantics = [#tpu.dimension_semantics<parallel>], iteration_bounds = array<i64: 1>, scalar_prefetch = 0 : i64, scratch_operands = 0 : i64, tpu.core_type = #tpu.core_type<tc>, window_params = [{transform_indices = @transform_0, window_bounds = array<i64: 8, 64>}, {pipeline_mode = #tpu.pipeline_mode<synchronous>, transform_indices = @transform_1, window_bounds = array<i64: 64, 32>}, {pipeline_mode = #tpu.pipeline_mode<synchronous>, transform_indices = @transform_2, window_bounds = array<i64: 1, 32>}, {pipeline_mode = #tpu.pipeline_mode<synchronous>, transform_indices = @transform_3, window_bounds = array<i64: 32, 32>}, {pipeline_mode = #tpu.pipeline_mode<synchronous>, transform_indices = @transform_4, window_bounds = array<i64: 1, 32>}, {pipeline_mode = #tpu.pipeline_mode<synchronous>, transform_indices = @transform_5, window_bounds = array<i64: 32, 16>}, {pipeline_mode = #tpu.pipeline_mode<synchronous>, transform_indices = @transform_6, window_bounds = array<i64: 1, 16>}, {transform_indices = @transform_7, window_bounds = array<i64: 8, 8>}, {transform_indices = @transform_8, window_bounds = array<i64: 8, 8>}]} {
    %c0 = arith.constant 0 : index
    %c0_0 = arith.constant 0 : index
    %0 = vector.load %arg1[%c0, %c0_0] : memref<8x64xf32, #tpu.memory_space<vmem>>, vector<8x64xf32>
    %c0_1 = arith.constant 0 : index
    %c0_2 = arith.constant 0 : index
    %1 = vector.load %arg2[%c0_1, %c0_2] : memref<64x32xf32, #tpu.memory_space<vmem>>, vector<64x32xf32>
    %cst = arith.constant dense<0.000000e+00> : vector<8x32xf32>
    %2 = tpu.matmul %0, %1, %cst {dimension_numbers = #tpu.dot_dimension_numbers<[1], [0], [0], [1], [0, 0, 1, 1], [], []>} : vector<8x64xf32>, vector<64x32xf32>, vector<8x32xf32> -> vector<8x32xf32>
    %c0_3 = arith.constant 0 : index
    %c0_4 = arith.constant 0 : index
    %3 = vector.load %arg3[%c0_3, %c0_4] : memref<1x32xf32, #tpu.memory_space<vmem>>, vector<1x32xf32>
    %4 = vector.broadcast %3 : vector<1x32xf32> to vector<8x32xf32>
    %5 = arith.addf %2, %4 : vector<8x32xf32>
    %cst_5 = arith.constant 0.000000e+00 : f32
    %6 = vector.broadcast %cst_5 : f32 to vector<8x32xf32>
    %7 = arith.maximumf %5, %6 : vector<8x32xf32>
    %c0_6 = arith.constant 0 : index
    %c0_7 = arith.constant 0 : index
    %8 = vector.load %arg4[%c0_6, %c0_7] : memref<32x32xf32, #tpu.memory_space<vmem>>, vector<32x32xf32>
    %cst_8 = arith.constant dense<0.000000e+00> : vector<8x32xf32>
    %9 = tpu.matmul %7, %8, %cst_8 {dimension_numbers = #tpu.dot_dimension_numbers<[1], [0], [0], [1], [0, 0, 1, 1], [], []>} : vector<8x32xf32>, vector<32x32xf32>, vector<8x32xf32> -> vector<8x32xf32>
    %c0_9 = arith.constant 0 : index
    %c0_10 = arith.constant 0 : index
    %10 = vector.load %arg5[%c0_9, %c0_10] : memref<1x32xf32, #tpu.memory_space<vmem>>, vector<1x32xf32>
    %11 = vector.broadcast %10 : vector<1x32xf32> to vector<8x32xf32>
    %12 = arith.addf %9, %11 : vector<8x32xf32>
    %cst_11 = arith.constant 0.000000e+00 : f32
    %13 = vector.broadcast %cst_11 : f32 to vector<8x32xf32>
    %14 = arith.maximumf %12, %13 : vector<8x32xf32>
    %c0_12 = arith.constant 0 : index
    %c0_13 = arith.constant 0 : index
    %15 = vector.load %arg6[%c0_12, %c0_13] : memref<32x16xf32, #tpu.memory_space<vmem>>, vector<32x16xf32>
    %cst_14 = arith.constant dense<0.000000e+00> : vector<8x16xf32>
    %16 = tpu.matmul %14, %15, %cst_14 {dimension_numbers = #tpu.dot_dimension_numbers<[1], [0], [0], [1], [0, 0, 1, 1], [], []>} : vector<8x32xf32>, vector<32x16xf32>, vector<8x16xf32> -> vector<8x16xf32>
    %c0_15 = arith.constant 0 : index
    %c0_16 = arith.constant 0 : index
    %17 = vector.load %arg7[%c0_15, %c0_16] : memref<1x16xf32, #tpu.memory_space<vmem>>, vector<1x16xf32>
    %18 = vector.broadcast %17 : vector<1x16xf32> to vector<8x16xf32>
    %19 = arith.addf %16, %18 : vector<8x16xf32>
    %20 = vector.extract_strided_slice %19 {offsets = [0, 0], sizes = [8, 8], strides = [1, 1]} : vector<8x16xf32> to vector<8x8xf32>
    %c0_17 = arith.constant 0 : index
    %c0_18 = arith.constant 0 : index
    %21 = vector.load %arg8[%c0_17, %c0_18] : memref<8x8xf32, #tpu.memory_space<vmem>>, vector<8x8xf32>
    tpu.vector_store %arg8[%c0_17, %c0_18], %20 {strides = array<i32>} : memref<8x8xf32, #tpu.memory_space<vmem>>, vector<8x8xf32>,
    %22 = vector.extract_strided_slice %19 {offsets = [0, 8], sizes = [8, 8], strides = [1, 1]} : vector<8x16xf32> to vector<8x8xf32>
    %c0_19 = arith.constant 0 : index
    %c0_20 = arith.constant 0 : index
    %23 = vector.load %arg9[%c0_19, %c0_20] : memref<8x8xf32, #tpu.memory_space<vmem>>, vector<8x8xf32>
    tpu.vector_store %arg9[%c0_19, %c0_20], %22 {strides = array<i32>} : memref<8x8xf32, #tpu.memory_space<vmem>>, vector<8x8xf32>,
    return
  }
  func.func @transform_0(%arg0: i32) -> (i32, i32) {
    %c0_i32 = arith.constant 0 : i32
    %c0_i32_0 = arith.constant 0 : i32
    return %arg0, %c0_i32 : i32, i32
  }
  func.func @transform_1(%arg0: i32) -> (i32, i32) {
    %c0_i32 = arith.constant 0 : i32
    %c0_i32_0 = arith.constant 0 : i32
    %c0_i32_1 = arith.constant 0 : i32
    return %c0_i32, %c0_i32_0 : i32, i32
  }
  func.func @transform_2(%arg0: i32) -> (i32, i32) {
    %c0_i32 = arith.constant 0 : i32
    %c0_i32_0 = arith.constant 0 : i32
    %c0_i32_1 = arith.constant 0 : i32
    return %c0_i32, %c0_i32_0 : i32, i32
  }
  func.func @transform_3(%arg0: i32) -> (i32, i32) {
    %c0_i32 = arith.constant 0 : i32
    %c0_i32_0 = arith.constant 0 : i32
    %c0_i32_1 = arith.constant 0 : i32
    return %c0_i32, %c0_i32_0 : i32, i32
  }
  func.func @transform_4(%arg0: i32) -> (i32, i32) {
    %c0_i32 = arith.constant 0 : i32
    %c0_i32_0 = arith.constant 0 : i32
    %c0_i32_1 = arith.constant 0 : i32
    return %c0_i32, %c0_i32_0 : i32, i32
  }
  func.func @transform_5(%arg0: i32) -> (i32, i32) {
    %c0_i32 = arith.constant 0 : i32
    %c0_i32_0 = arith.constant 0 : i32
    %c0_i32_1 = arith.constant 0 : i32
    return %c0_i32, %c0_i32_0 : i32, i32
  }
  func.func @transform_6(%arg0: i32) -> (i32, i32) {
    %c0_i32 = arith.constant 0 : i32
    %c0_i32_0 = arith.constant 0 : i32
    %c0_i32_1 = arith.constant 0 : i32
    return %c0_i32, %c0_i32_0 : i32, i32
  }
  func.func @transform_7(%arg0: i32) -> (i32, i32) {
    %c0_i32 = arith.constant 0 : i32
    %c0_i32_0 = arith.constant 0 : i32
    return %arg0, %c0_i32 : i32, i32
  }
  func.func @transform_8(%arg0: i32) -> (i32, i32) {
    %c0_i32 = arith.constant 0 : i32
    %c0_i32_0 = arith.constant 0 : i32
    return %arg0, %c0_i32 : i32, i32
  }
}

</mosaic_0001>

<bundles_post_ra>
// kernel: tpu_custom_call.1
= control target key start
LH: loop header
LB: loop body
LE: loop exit
PB: predicated region body
PF: predicated region fallthrough
CT: control target
= control target key end

     0   :  { %14 = vsyncpa [#allocation3], 0  ;;  %s346_s0 = inlined_call_operand.vmem [shape: f32[8,64], index: 0, kind: input, shape index: {}]   ;;  %s347_s1 = inlined_call_operand.vmem [shape: f32[64,32], index: 1, kind: input, shape index: {}]   ;;  %s348_s2 = inlined_call_operand.vmem [shape: f32[1,32], index: 2, kind: input, shape index: {}]   ;;  %s349_s3 = inlined_call_operand.vmem [shape: f32[32,32], index: 3, kind: input, shape index: {}]   ;;  %s350_s4 = inlined_call_operand.vmem [shape: f32[1,32], index: 4, kind: input, shape index: {}]   ;;  %s351_s5 = inlined_call_operand.vmem [shape: f32[32,16], index: 5, kind: input, shape index: {}]   ;;  %s352_s6 = inlined_call_operand.vmem [shape: f32[1,16], index: 6, kind: input, shape index: {}]   ;;  %s353_s7 = inlined_call_operand.hbm [shape: f32[8,8], index: 7, kind: output, shape index: {0}]   ;;  %s354_s8 = inlined_call_operand.hbm [shape: f32[8,8], index: 8, kind: output, shape index: {1}]  }
   0x1   :  { %v38_v0 = vld [vmem:[%s347_s1 + $0x38] sm:$0xff]  ;;  %v37_v1 = vld [vmem:[%s347_s1 + $0x30] sm:$0xff]  ;;  %v36_v2 = vld [vmem:[%s347_s1 + $0x28] sm:$0xff] }
   0x2   :  { %55 = vmatpush.msra.mxu0 %v38_v0  ;;  %v35_v3 = vld [vmem:[%s347_s1 + $0x20] sm:$0xff]  ;;  %v71_v4 = vld [vmem:[%s349_s3 + $0x18] sm:$0xff] }
   0x3   :  { %92 = vmatpush.msra.mxu1 %v71_v4 }
   0x4   :  { %56 = vmatpush.msra.mxu0 %v37_v1 }
   0x5   :  { %15 = vsyncpa [#allocation5], 0  ;;  %v34_v5 = vld [vmem:[%s347_s1 + $0x18] sm:$0xff]  ;;  %v33_v6 = vld [vmem:[%s347_s1 + $0x10] sm:$0xff]  ;;  %vm43_vm0 = vcmask 523264   ;;  %vm76_vm1 = vcmask 261120  }
   0x6   :  { %57 = vmatpush.msra.mxu0 %v36_v2  ;;  %v32_v7 = vld [vmem:[%s347_s1 + $0x8] sm:$0xff]  ;;  %v31_v8 = vld [vmem:[%s347_s1] sm:$0xff]  ;;  %v70_v10 = vld [vmem:[%s349_s3 + $0x10] sm:$0xff]  ;;  %s232_s19 = smov [#allocation2]   ;;  %s146_s23 = sshll.u32 %s353_s7, 4  ;;  %vm132_vm2 = vcmask 64512   ;;  %s147_s23 = int_to_ptr.hbm [resolvable:$true] %s146_s23 }
   0x7   :  { %v30_v9 = vld [vmem:[%s346_s0] sm:$0xff]  ;;  %93 = vmatpush.msra.mxu1 %v70_v10  ;;  %v69_v11 = vld [vmem:[%s349_s3 + $0x8] sm:$0xff]  ;;  %v104_v13 = vld [vmem:[%s351_s5 + $0x18] sm:$0xff]  ;;  %s144_s20 = sshll.u32 %s232_s19, 4  ;;  %s145_s20 = int_to_ptr.vmem [resolvable:$true] %s144_s20 }
   0x8   :  { %58 = vmatpush.msra.mxu0 %v35_v3  ;;  %v68_v12 = vld [vmem:[%s349_s3] sm:$0xff]  ;;  %124 = vmatpush.msra.mxu2 %v104_v13  ;;  %v103_v18 = vld [vmem:[%s351_s5 + $0x10] sm:$0xff]  ;;  %v102_v19 = vld [vmem:[%s351_s5 + $0x8] sm:$0xff] }
   0x9   :  { %94 = vmatpush.msra.mxu1 %v69_v11  ;;  %v177_v14 = vld [vmem:[%s348_s2] ss:$0 sm:$0xff] }
   0xa   :  { %59 = vmatpush.msra.mxu0 %v34_v5  ;;  %125 = vmatpush.msra.mxu2 %v103_v18  ;;  %v101_v20 = vld [vmem:[%s351_s5] sm:$0xff]  ;;  %s234_s5 = smov [#allocation4]  }
   0xb   :  { %95 = vmatpush.msra.mxu1 %v68_v12  ;;  %v178_v21 = vld [vmem:[%s350_s4] ss:$0 sm:$0xff]  ;;  %s233_s4 = smov 120   ;;  %s155_s24 = sshll.u32 %s234_s5, 4  ;;  %s156_s24 = int_to_ptr.vmem [resolvable:$true] %s155_s24 }
   0xc   :  { %60 = vmatpush.msra.mxu0 %v33_v6  ;;  %126 = vmatpush.msra.mxu2 %v102_v19  ;;  %v179_v25 = vld [vmem:[%s352_s6] ss:$0 sm:$0xff]  ;;  %s157_s6 = sshll.u32 %s354_s8, 4  ;;  %s158_s6 = int_to_ptr.hbm [resolvable:$true] %s157_s6 }
   0xe   :  { %61 = vmatpush.msra.mxu0 %v32_v7  ;;  %127 = vmatpush.msra.mxu2 %v101_v20 }
  0x10   :  { %62 = vmatpush.msra.mxu0 %v31_v8 }
  0x11   :  { %171 = vmatmul.msk.f32.vlgmr.msra.gmra.mxu0 %vm43_vm0, %v30_v9 }
  0x8e   :  { %v64_v15 = vpop.f32.mrf.mxu0 }
  0x8f   :  { %v65_v16 = vadd.f32 %v177_v14, %v64_v15 }
  0x91   :  { %v67_v17 = vmax.f32 %v65_v16, 0.0 }
  0x93   :  { %172 = vmatmul.msk.f32.vlgmr.msra.gmra.mxu1 %vm76_vm1, %v67_v17 }
 0x110   :  { %v97_v22 = vpop.f32.mrf.mxu1 }
 0x111   :  { %v98_v23 = vadd.f32 %v178_v21, %v97_v22 }
 0x113   :  { %v100_v24 = vmax.f32 %v98_v23, 0.0 }
 0x115   :  { %173 = vmatmul.msk.f32.vlgmr.msra.gmra.mxu2 %vm76_vm1, %v100_v24 }
 0x198   :  { %v129_v26 = vpop.f32.mrf.mxu2 }
 0x199   :  { %v130_v27 = vadd.f32 %v179_v25, %v129_v26 }
 0x19b   :  { %135 = vrot.lane.b32.xlu0 %v130_v27, %s233_s4  ;;  %133 = vst.msk [vmem:[#allocation2] sm:$0xff] %vm132_vm2, %v130_v27 }
 0x19c   :  { %149 = dma.vmem_to_hbm [thread:$0]  %s145_s20, 128, %s147_s23, [#allocation3]  }
 0x20d   :  { %v136_v28 = vpop.permute.xlu0 %135 }
 0x20e   :  { %138 = vst.msk [vmem:[#allocation4] sm:$0xff] %vm132_vm2, %v136_v28 }
 0x20f   :  { %160 = dma.vmem_to_hbm [thread:$0]  %s156_s24, 128, %s158_s6, [#allocation5]  }
 0x210   :  { %228 = dma.done.wait [#allocation3], 128  }
 0x211   :  { %229 = vsyncadd [#allocation3], 4294967168 }
 0x212   :  { %230 = dma.done.wait [#allocation5], 128  }
 0x213   :  { %231 = vsyncadd [#allocation5], 4294967168 }
 0x214   :  { %169 = vsyncpa [#allocation3], 1 }
 0x215   :  { %170 = vsyncpa [#allocation5], 1 }

</bundles_post_ra>
